<compile_context>
chip_gen: v5e
topology: v5e:2x2
jax: 0.10.0
libtpu: 0.0.40
codegen_flags: <defaults>
</compile_context>

<pallas_src>
import functools

import jax
import jax.numpy as jnp
import numpy as np
from jax import lax
from jax.experimental import pallas as pl
from jax.experimental.pallas import tpu as pltpu

LANE = 128      # TPU lane width: data laid out as (rows, 128)
SUB = 8         # f32 sublane granularity (accumulator height)
ROW_GRAN = 32   # row-tile granularity that also covers int8/bool (32,128) tiles
NUM_CORES = 2   # v7x has 2 TensorCores; harmless (serial outer loop) on v5e/v6e


def _contrastive_loss_kernel(sim_ref, lab_ref, out_ref, acc_ref, *,
                             margin, inv_n, n_rows, br, nbi):
    """One grid step: reduce a (br, LANE) tile into the per-core accumulator.

    sim_ref, lab_ref: (br, LANE) tiles in their native dtypes
    out_ref:          (1, LANE) f32 per-core partial sums (lane-dense)
    acc_ref:          (SUB, LANE) f32 VMEM scratch, resident across the j axis
    """
    c = pl.program_id(0)                  # core ("parallel") axis
    j = pl.program_id(1)                  # row-block ("arbitrary") reduction axis
    g = c * nbi + j                       # global row-block index

    @pl.when(j == 0)
    def _init():
        acc_ref[...] = jnp.zeros_like(acc_ref)

    # Cast-on-load: inputs stream at their native width (f32 / bf16 / int8).
    s = sim_ref[...].astype(jnp.float32)
    lab = lab_ref[...].astype(jnp.float32)

    # Per-element loss.  Exact lerp rewrite of
    #   (1 - lab) * pos + 0.25 * lab * (1 - s)^2
    # (valid for fractional labels as well) to trim VPU ops.
    pos = jnp.where(s < margin, s * s, 0.0)
    d = 1.0 - s
    neg = 0.25 * (d * d)
    per = pos + lab * (neg - pos)

    def _accumulate(x):
        # (br, LANE) -> (br//8, 8, LANE) is layout-preserving; the axis-0 sum
        # is pure VPU vreg adds (no per-step XLU cross-lane reduction).
        acc_ref[...] += x.reshape(br // SUB, SUB, LANE).sum(axis=0)

    rows_left = n_rows - g * br           # scalar; n_rows / br are static

    @pl.when(rows_left >= br)             # interior block: no mask needed
    def _full():
        _accumulate(per)

    @pl.when(rows_left < br)              # ragged / redundant boundary block
    def _ragged():
        row_idx = lax.broadcasted_iota(jnp.int32, (br, LANE), 0)
        _accumulate(jnp.where(row_idx < rows_left, per, 0.0))

    @pl.when(j == pl.num_programs(1) - 1)
    def _finalize():
        # Single cross-sublane reduce per core; keep lanes (lane-dense store).
        out_ref[...] = jnp.sum(acc_ref[...], axis=0, keepdims=True) * inv_n


def contrastive_loss_forward(similarity, label, margin=2.0, block_rows=1024):
    """Pallas implementation of ContrastiveLoss.forward.

    similarity: any shape, f32 or bf16 similarity score per pair
    label:      same shape; float, int8 or bool (0/1; fractional floats also OK)
    returns: scalar f32 loss
    """
    sim = similarity.reshape(-1)
    lab = label.reshape(-1)
    if lab.dtype == jnp.bool_:
        lab = lab.astype(jnp.int8)        # keep the label stream 1 byte/element
    n = sim.shape[0]

    rows = n // LANE
    if n % LANE == 0 and rows >= ROW_GRAN:
        # Common case: free reshape, no HBM re-materialization of the inputs.
        sim2 = sim.reshape(rows, LANE)
        lab2 = lab.reshape(rows, LANE)
    else:
        # Ragged / tiny inputs: tail-pad with (sim=1, label=1), which
        # contributes exactly zero to both loss terms.
        # TODO(synk): this branch re-materializes the inputs once; it is only
        # hit when n is not a multiple of 128 (or n < 4096).
        rows = max(ROW_GRAN, pl.cdiv(n, LANE))
        pad = rows * LANE - n
        sim2 = jnp.pad(sim, (0, pad), constant_values=1).reshape(rows, LANE)
        lab2 = jnp.pad(lab, (0, pad), constant_values=1).reshape(rows, LANE)

    # Row tile: multiple of 32 (covers the int8 (32,128) min tile), <= rows.
    br = max(ROW_GRAN, (int(block_rows) // ROW_GRAN) * ROW_GRAN)
    br = min(br, (rows // ROW_GRAN) * ROW_GRAN)
    nb = pl.cdiv(rows, br)                          # number of real row blocks
    ncores = NUM_CORES if nb >= NUM_CORES else 1
    nbi = pl.cdiv(nb, ncores)                       # row blocks per core

    def in_index_map(c, j):
        # Clamp redundant trailing blocks (when nb is odd) onto the last real
        # block; the kernel masks them to zero via rows_left.
        return (jnp.minimum(c * nbi + j, nb - 1), 0)

    kernel = functools.partial(
        _contrastive_loss_kernel,
        margin=float(margin), inv_n=1.0 / float(n),
        n_rows=rows, br=br, nbi=nbi)

    partials = pl.pallas_call(
        kernel,
        grid=(ncores, nbi),
        in_specs=[
            pl.BlockSpec((br, LANE), in_index_map),   # similarity tiles
            pl.BlockSpec((br, LANE), in_index_map),   # label tiles
        ],
        # Lane-dense per-core partial sums; the block is revisited across j.
        out_specs=pl.BlockSpec((1, LANE), lambda c, j: (0, c)),
        out_shape=jax.ShapeDtypeStruct((1, ncores * LANE), jnp.float32),
        scratch_shapes=[pltpu.VMEM((SUB, LANE), jnp.float32)],
        compiler_params=pltpu.CompilerParams(
            dimension_semantics=("parallel", "arbitrary")),
    )(sim2, lab2)

    # Tiny (1, ncores*128) cross-core / cross-lane reduction in the wrapper.
    return jnp.sum(partials)


def contrastive_loss_reference(similarity, label, margin=2.0):
    """Pure-JAX reference mirroring the PyTorch forward exactly."""
    s = similarity.astype(jnp.float32)
    l = label.astype(jnp.float32)
    pos = jnp.where(s < margin, s * s, 0.0)
    return jnp.mean((1.0 - l) * pos + l * 0.25 * (1.0 - s) ** 2)


if __name__ == "__main__":
    key = jax.random.PRNGKey(0)
    margin = 2.0

    # (n, sim_dtype, lab_dtype, block_rows): a tiny batch matching the
    # module's per-pair scalar similarity, a ragged tail-pad case, a no-copy
    # multi-block case split across 2 cores with a ragged last block, and a
    # narrow-dtype case with an odd block count (redundant/clamped block).
    cases = [
        (8,         jnp.float32,  jnp.float32, 1024),
        (2100,      jnp.float32,  jnp.float32, 1024),
        (200 * 128, jnp.float32,  jnp.float32, 64),
        (170 * 128, jnp.bfloat16, jnp.int8,    64),
    ]
    for idx, (n, sdt, ldt, brows) in enumerate(cases):
        k_s, k_l = jax.random.split(jax.random.fold_in(key, idx))
        sim = (2.5 * jax.random.normal(k_s, (n,), jnp.float32)).astype(sdt)
        lab = (jax.random.uniform(k_l, (n,)) < 0.5).astype(ldt)

        loss = contrastive_loss_forward(sim, lab, margin=margin,
                                        block_rows=brows)
        loss = jax.block_until_ready(loss)

        loss_ref = contrastive_loss_reference(sim, lab, margin=margin)
        np.testing.assert_allclose(np.asarray(loss), np.asarray(loss_ref),
                                   rtol=1e-4, atol=1e-6)

    print("KERNEL_OK")
</pallas_src>

<mosaic_0001>
module attributes {stable_mosaic.version = 11 : i64} {
  func.func @_contrastive_loss_kernel(%arg0: i32, %arg1: i32, %arg2: memref<32x128xf32, #tpu.memory_space<vmem>>, %arg3: memref<32x128xf32, #tpu.memory_space<vmem>>, %arg4: memref<1x128xf32, #tpu.memory_space<vmem>>, %arg5: memref<8x128xf32, #tpu.memory_space<vmem>>) attributes {dimension_semantics = [#tpu.dimension_semantics<parallel>, #tpu.dimension_semantics<arbitrary>], iteration_bounds = array<i64: 1, 1>, scalar_prefetch = 0 : i64, scratch_operands = 1 : i64, tpu.core_type = #tpu.core_type<tc>, window_params = [{transform_indices = @transform_0, window_bounds = array<i64: 32, 128>}, {transform_indices = @transform_1, window_bounds = array<i64: 32, 128>}, {transform_indices = @transform_2, window_bounds = array<i64: 1, 128>}]} {
    %c1_i32 = arith.constant 1 : i32
    %0 = arith.muli %arg0, %c1_i32 : i32
    %1 = arith.addi %0, %arg1 : i32
    %c0_i32 = arith.constant 0 : i32
    %2 = arith.cmpi eq, %arg1, %c0_i32 : i32
    %3 = arith.extui %2 : i1 to i32
    %c0_i32_0 = arith.constant 0 : i32
    %4 = arith.cmpi ne, %3, %c0_i32_0 : i32
    scf.if %4 {
      %cst_14 = arith.constant 0.000000e+00 : f32
      %31 = vector.broadcast %cst_14 : f32 to vector<8x128xf32>
      %c0_15 = arith.constant 0 : index
      %c0_16 = arith.constant 0 : index
      %32 = vector.load %arg5[%c0_15, %c0_16] : memref<8x128xf32, #tpu.memory_space<vmem>>, vector<8x128xf32>
      tpu.vector_store %arg5[%c0_15, %c0_16], %31 {strides = array<i32>} : memref<8x128xf32, #tpu.memory_space<vmem>>, vector<8x128xf32>,
    } else {
    }
    %c0 = arith.constant 0 : index
    %c0_1 = arith.constant 0 : index
    %5 = vector.load %arg2[%c0, %c0_1] : memref<32x128xf32, #tpu.memory_space<vmem>>, vector<32x128xf32>
    %c0_2 = arith.constant 0 : index
    %c0_3 = arith.constant 0 : index
    %6 = vector.load %arg3[%c0_2, %c0_3] : memref<32x128xf32, #tpu.memory_space<vmem>>, vector<32x128xf32>
    %cst = arith.constant 2.000000e+00 : f32
    %7 = vector.broadcast %cst : f32 to vector<32x128xf32>
    %8 = arith.cmpf olt, %5, %7 : vector<32x128xf32>
    %9 = arith.mulf %5, %5 : vector<32x128xf32>
    %cst_4 = arith.constant 0.000000e+00 : f32
    %10 = vector.broadcast %cst_4 : f32 to vector<32x128xf32>
    %11 = arith.select %8, %9, %10 : vector<32x128xi1>, vector<32x128xf32>
    %cst_5 = arith.constant 1.000000e+00 : f32
    %12 = vector.broadcast %cst_5 : f32 to vector<32x128xf32>
    %13 = arith.subf %12, %5 : vector<32x128xf32>
    %14 = arith.mulf %13, %13 : vector<32x128xf32>
    %cst_6 = arith.constant 2.500000e-01 : f32
    %15 = vector.broadcast %cst_6 : f32 to vector<32x128xf32>
    %16 = arith.mulf %15, %14 : vector<32x128xf32>
    %17 = arith.subf %16, %11 : vector<32x128xf32>
    %18 = arith.mulf %6, %17 : vector<32x128xf32>
    %19 = arith.addf %11, %18 : vector<32x128xf32>
    %c32_i32 = arith.constant 32 : i32
    %20 = arith.muli %1, %c32_i32 : i32
    %c32_i32_7 = arith.constant 32 : i32
    %21 = arith.subi %c32_i32_7, %20 : i32
    %c32_i32_8 = arith.constant 32 : i32
    %22 = arith.cmpi sge, %21, %c32_i32_8 : i32
    %23 = arith.extui %22 : i1 to i32
    %c0_i32_9 = arith.constant 0 : i32
    %24 = arith.cmpi ne, %23, %c0_i32_9 : i32
    scf.if %24 {
      %c0_14 = arith.constant 0 : index
      %c0_15 = arith.constant 0 : index
      %31 = vector.load %arg5[%c0_14, %c0_15] : memref<8x128xf32, #tpu.memory_space<vmem>>, vector<8x128xf32>
      %32 = vector.shape_cast %19 : vector<32x128xf32> to vector<4x8x128xf32>
      %cst_16 = arith.constant dense<0.000000e+00> : vector<8x128xf32>
      %33 = vector.multi_reduction <add>, %32, %cst_16 [0] : vector<4x8x128xf32> to vector<8x128xf32>
      %34 = arith.addf %31, %33 : vector<8x128xf32>
      %c0_17 = arith.constant 0 : index
      %c0_18 = arith.constant 0 : index
      %35 = vector.load %arg5[%c0_17, %c0_18] : memref<8x128xf32, #tpu.memory_space<vmem>>, vector<8x128xf32>
      tpu.vector_store %arg5[%c0_17, %c0_18], %34 {strides = array<i32>} : memref<8x128xf32, #tpu.memory_space<vmem>>, vector<8x128xf32>,
    } else {
    }
    %c32_i32_10 = arith.constant 32 : i32
    %25 = arith.cmpi slt, %21, %c32_i32_10 : i32
    %26 = arith.extui %25 : i1 to i32
    %c0_i32_11 = arith.constant 0 : i32
    %27 = arith.cmpi ne, %26, %c0_i32_11 : i32
    scf.if %27 {
      %31 = tpu.iota {dimensions = array<i32: 0>} : vector<32x128xi32>
      %32 = vector.broadcast %21 : i32 to vector<32x128xi32>
      %33 = arith.cmpi slt, %31, %32 : vector<32x128xi32>
      %cst_14 = arith.constant 0.000000e+00 : f32
      %34 = vector.broadcast %cst_14 : f32 to vector<32x128xf32>
      %35 = arith.select %33, %19, %34 : vector<32x128xi1>, vector<32x128xf32>
      %c0_15 = arith.constant 0 : index
      %c0_16 = arith.constant 0 : index
      %36 = vector.load %arg5[%c0_15, %c0_16] : memref<8x128xf32, #tpu.memory_space<vmem>>, vector<8x128xf32>
      %37 = vector.shape_cast %35 : vector<32x128xf32> to vector<4x8x128xf32>
      %cst_17 = arith.constant dense<0.000000e+00> : vector<8x128xf32>
      %38 = vector.multi_reduction <add>, %37, %cst_17 [0] : vector<4x8x128xf32> to vector<8x128xf32>
      %39 = arith.addf %36, %38 : vector<8x128xf32>
      %c0_18 = arith.constant 0 : index
      %c0_19 = arith.constant 0 : index
      %40 = vector.load %arg5[%c0_18, %c0_19] : memref<8x128xf32, #tpu.memory_space<vmem>>, vector<8x128xf32>
      tpu.vector_store %arg5[%c0_18, %c0_19], %39 {strides = array<i32>} : memref<8x128xf32, #tpu.memory_space<vmem>>, vector<8x128xf32>,
    } else {
    }
    %c0_i32_12 = arith.constant 0 : i32
    %28 = arith.cmpi eq, %arg1, %c0_i32_12 : i32
    %29 = arith.extui %28 : i1 to i32
    %c0_i32_13 = arith.constant 0 : i32
    %30 = arith.cmpi ne, %29, %c0_i32_13 : i32
    scf.if %30 {
      %c0_14 = arith.constant 0 : index
      %c0_15 = arith.constant 0 : index
      %31 = vector.load %arg5[%c0_14, %c0_15] : memref<8x128xf32, #tpu.memory_space<vmem>>, vector<8x128xf32>
      %cst_16 = arith.constant dense<0.000000e+00> : vector<128xf32>
      %32 = vector.multi_reduction <add>, %31, %cst_16 [0] : vector<8x128xf32> to vector<128xf32>
      %33 = vector.shape_cast %32 : vector<128xf32> to vector<1x128xf32>
      %cst_17 = arith.constant 1.250000e-01 : f32
      %34 = vector.broadcast %cst_17 : f32 to vector<1x128xf32>
      %35 = arith.mulf %33, %34 : vector<1x128xf32>
      %c0_18 = arith.constant 0 : index
      %c0_19 = arith.constant 0 : index
      %36 = vector.load %arg4[%c0_18, %c0_19] : memref<1x128xf32, #tpu.memory_space<vmem>>, vector<1x128xf32>
      tpu.vector_store %arg4[%c0_18, %c0_19], %35 {strides = array<i32>} : memref<1x128xf32, #tpu.memory_space<vmem>>, vector<1x128xf32>,
    } else {
    }
    return
  }
  func.func @transform_0(%arg0: i32, %arg1: i32) -> (i32, i32) {
    %c1_i32 = arith.constant 1 : i32
    %0 = arith.muli %arg0, %c1_i32 : i32
    %1 = arith.addi %0, %arg1 : i32
    %c0_i32 = arith.constant 0 : i32
    %2 = arith.minsi %1, %c0_i32 : i32
    %c0_i32_0 = arith.constant 0 : i32
    %c0_i32_1 = arith.constant 0 : i32
    return %2, %c0_i32_0 : i32, i32
  }
  func.func @transform_1(%arg0: i32, %arg1: i32) -> (i32, i32) {
    %c1_i32 = arith.constant 1 : i32
    %0 = arith.muli %arg0, %c1_i32 : i32
    %1 = arith.addi %0, %arg1 : i32
    %c0_i32 = arith.constant 0 : i32
    %2 = arith.minsi %1, %c0_i32 : i32
    %c0_i32_0 = arith.constant 0 : i32
    %c0_i32_1 = arith.constant 0 : i32
    return %2, %c0_i32_0 : i32, i32
  }
  func.func @transform_2(%arg0: i32, %arg1: i32) -> (i32, i32) {
    %c0_i32 = arith.constant 0 : i32
    %c0_i32_0 = arith.constant 0 : i32
    return %c0_i32, %arg0 : i32, i32
  }
}

</mosaic_0001>

<bundles_post_ra>
// kernel: tpu_custom_call.1
= control target key start
LH: loop header
LB: loop body
LE: loop exit
PB: predicated region body
PF: predicated region fallthrough
CT: control target
= control target key end

     0   :  { %7 = vsyncpa [#allocation4], 0  ;;  %s296_s0 = inlined_call_operand.hbm [shape: f32[32,128], index: 0, kind: input, shape index: {}]   ;;  %s297_s1 = inlined_call_operand.hbm [shape: f32[32,128], index: 1, kind: input, shape index: {}]   ;;  %s298_s2 = inlined_call_operand.hbm [shape: f32[1,128], index: 2, kind: output, shape index: {}]  }
   0x1   :  { %8 = vsyncpa [#allocation7], 0 }
   0x2   :  { %9 = vsyncpa [#allocation5], 0  ;;  %s20_s11 = sshll.u32 %s296_s0, 4  ;;  %s267_s12 = smov [#allocation3]   ;;  %s21_s11 = int_to_ptr.hbm [resolvable:$true] %s20_s11 }
   0x3   :  { %s22_s13 = sshll.u32 %s267_s12, 4  ;;  %s39_s16 = sshll.u32 %s297_s1, 4  ;;  %s23_s13 = int_to_ptr.vmem [resolvable:$true] %s22_s13  ;;  %s40_s16 = int_to_ptr.hbm [resolvable:$true] %s39_s16 }
   0x4   :  { %s268_s17 = smov 128   ;;  %s269_s18 = smov 8  }
   0x5   :  { %28 = dma.hbm_to_vmem [thread:$0]  %s21_s11, 512, %s23_s13, [#allocation4], %s268_s17, %s268_s17, %s269_s18  }
   0x6   :  { %s270_s19 = smov [#allocation6]  }
   0x7   :  { %s41_s20 = sshll.u32 %s270_s19, 4  ;;  %s42_s20 = int_to_ptr.vmem [resolvable:$true] %s41_s20 }
   0x8   :  { %47 = dma.hbm_to_vmem [thread:$0]  %s40_s16, 512, %s42_s20, [#allocation7], %s268_s17, %s268_s17, %s269_s18  }
   0x9   :  { %261 = dma.done.wait [#allocation4], 512  }
   0xa   :  { %262 = vsyncadd [#allocation4], 4294966784 }
   0xb   :  { %263 = dma.done.wait [#allocation7], 512  }
   0xc   :  { %264 = vsyncadd [#allocation7], 4294966784  ;;  %v70_v0 = vld [vmem:[#allocation3] sm:$0xff]  ;;  %v71_v1 = vld [vmem:[#allocation3 + $0x8] sm:$0xff]  ;;  %s271_s0 = smov [#allocation8]   ;;  %s169_s23 = sshll.u32 %s298_s2, 4  ;;  %s170_s23 = int_to_ptr.hbm [resolvable:$true] %s169_s23 }
   0xd   :  { %v72_v2 = vld [vmem:[#allocation3 + $0x10] sm:$0xff]  ;;  %v73_v3 = vld [vmem:[#allocation3 + $0x18] sm:$0xff]  ;;  %vm78_vm0 = vcmp.lt.f32.partialorder %v70_v0, 2.0  ;;  %vm79_vm1 = vcmp.lt.f32.partialorder %v71_v1, 2.0  ;;  %v82_v4 = vmul.f32 %v70_v0, %v70_v0  ;;  %v83_v5 = vmul.f32 %v71_v1, %v71_v1  ;;  %v74_v23 = vld [vmem:[#allocation6] sm:$0xff]  ;;  %s167_s1 = sshll.u32 %s271_s0, 4  ;;  %s168_s1 = int_to_ptr.vmem [resolvable:$true] %s167_s1 }
   0xe   :  { %vm80_vm2 = vcmp.lt.f32.partialorder %v72_v2, 2.0  ;;  %v84_v6 = vmul.f32 %v72_v2, %v72_v2  ;;  %v85_v7 = vmul.f32 %v73_v3, %v73_v3  ;;  %v90_v8 = vsub.f32 1.0, %v70_v0  ;;  %v75_v24 = vld [vmem:[#allocation6 + $0x8] sm:$0xff]  ;;  %v76_v25 = vld [vmem:[#allocation6 + $0x10] sm:$0xff]  ;;  %v77_v27 = vld [vmem:[#allocation6 + $0x18] sm:$0xff] }
   0xf   :  { %v91_v9 = vsub.f32 1.0, %v71_v1  ;;  %v92_v10 = vsub.f32 1.0, %v72_v2  ;;  %vm81_vm3 = vcmp.lt.f32.partialorder %v73_v3, 2.0  ;;  %v93_v11 = vsub.f32 1.0, %v73_v3 }
  0x10   :  { %v94_v12 = vmul.f32 %v90_v8, %v90_v8  ;;  %v86_v15 = vsel %vm78_vm0, %v82_v4, 0.0  ;;  %v87_v16 = vsel %vm79_vm1, %v83_v5, 0.0  ;;  %v88_v17 = vsel %vm80_vm2, %v84_v6, 0.0 }
  0x11   :  { %v95_v13 = vmul.f32 %v91_v9, %v91_v9  ;;  %v96_v14 = vmul.f32 %v92_v10, %v92_v10  ;;  %v97_v18 = vmul.f32 %v93_v11, %v93_v11  ;;  %v89_v19 = vsel %vm81_vm3, %v85_v7, 0.0 }
  0x12   :  { %v98_v20 = vmul.f32 0.25, %v94_v12 }
  0x13   :  { %v99_v21 = vmul.f32 0.25, %v95_v13  ;;  %v100_v22 = vmul.f32 0.25, %v96_v14  ;;  %v101_v26 = vmul.f32 0.25, %v97_v18 }
  0x14   :  { %v102_v28 = vsub.f32 %v98_v20, %v86_v15 }
  0x15   :  { %v103_v29 = vsub.f32 %v99_v21, %v87_v16  ;;  %v104_v30 = vsub.f32 %v100_v22, %v88_v17  ;;  %v105_v31 = vsub.f32 %v101_v26, %v89_v19 }
  0x16   :  { %v106_v32 = vmul.f32 %v102_v28, %v74_v23 }
  0x17   :  { %v107_v33 = vmul.f32 %v103_v29, %v75_v24  ;;  %v108_v34 = vmul.f32 %v104_v30, %v76_v25  ;;  %v109_v35 = vmul.f32 %v105_v31, %v77_v27 }
  0x18   :  { %v110_v36 = vadd.f32 %v106_v32, %v86_v15 }
  0x19   :  { %v111_v37 = vadd.f32 %v107_v33, %v87_v16  ;;  %v112_v38 = vadd.f32 %v108_v34, %v88_v17  ;;  %v113_v39 = vadd.f32 %v109_v35, %v89_v19 }
  0x1b   :  { %v121_v40 = vadd.f32 %v111_v37, %v110_v36 }
  0x1d   :  { %v122_v41 = vadd.f32 %v121_v40, %v112_v38 }
  0x1f   :  { %v123_v42 = vadd.f32 %v122_v41, %v113_v39 }
  0x21   :  { %v154_v43 = vrot.slane %v123_v42, 4 }
  0x23   :  { %v155_v44 = vadd.f32 %v154_v43, %v123_v42 }
  0x25   :  { %v156_v45 = vrot.slane %v155_v44, 2 }
  0x27   :  { %v157_v46 = vadd.f32 %v156_v45, %v155_v44 }
  0x29   :  { %v158_v47 = vrot.slane %v157_v46, 1 }
  0x2b   :  { %v159_v48 = vadd.f32 %v158_v47, %v157_v46 }
  0x2d   :  { %v160_v49 = vmul.f32 0.125, %v159_v48 }
  0x2f   :  { %161 = vst [vmem:[#allocation8] sm:$0x1] %v160_v49 }
  0x30   :  { %172 = dma.vmem_to_hbm [thread:$0]  %s168_s1, 16, %s170_s23, [#allocation5]  }
  0x31   :  { %265 = dma.done.wait [#allocation5], 16  }
  0x32   :  { %266 = vsyncadd [#allocation5], 4294967280 }
  0x33   :  { %177 = vsyncpa [#allocation4], 1 }
  0x34   :  { %178 = vsyncpa [#allocation7], 1 }
  0x35   :  { %179 = vsyncpa [#allocation5], 1 }

</bundles_post_ra>
